<compile_context>
chip_gen: v5e
topology: v5e:2x2
jax: 0.10.0
libtpu: 0.0.40
codegen_flags: <defaults>
</compile_context>

<pallas_src>
import functools

import jax
import jax.numpy as jnp
from jax.experimental import pallas as pl
from jax.experimental.pallas import tpu as pltpu

# dot_general dimension_numbers for "x @ y.T": contract the last dim of both.
_CONTRACT_LAST = (((1,), (1,)), ((), ()))


def _transition_kernel(xcat_ref, sigma_ref, A_ref, Wcat_ref, o_ref, w_ref,
                       mean_ref, cov_ref, *, min_var, batch, state_dim):
    A = A_ref[...]                                             # [D, D]

    # ---- Mean: [mu | action] @ [A | B].T + o  (single fused GEMM) ----------
    mean = (jax.lax.dot_general(xcat_ref[...], Wcat_ref[...], _CONTRACT_LAST,
                                preferred_element_type=jnp.float32)
            + o_ref[...])
    mean_ref[...] = mean.astype(mean_ref.dtype)

    # ---- Covariance: C[b] = diag(softplus(w)+min_var) + A @ sigma[b] @ A.T --
    # GEMM 1, stacked over the whole batch (one (B*D, D)x(D, D) pass):
    #   T2d[(b, j), k] = sum_l sigma[b, j, l] * A[k, l]  = (sigma[b] @ A.T)[j,k]
    T2d = jax.lax.dot_general(sigma_ref[...], A, _CONTRACT_LAST,
                              preferred_element_type=jnp.float32)  # [B*D, D]

    # Explicit restack (B*D, D) -> (D, B*D):
    #   T_wide[j, b*D + k] = T2d[b*D + j, k].
    # Exact for arbitrary sigma (no symmetry assumption); XLU slot is idle here.
    T_wide = jnp.concatenate(
        [T2d[b * state_dim:(b + 1) * state_dim, :] for b in range(batch)],
        axis=1)                                                # [D, B*D]

    # GEMM 2: one lane-dense (D, D)x(D, B*D) pass.
    #   C_wide[i, b*D + k] = (A @ sigma[b] @ A.T)[i, k]
    C_wide = jnp.dot(A, T_wide, preferred_element_type=jnp.float32)  # [D, B*D]

    # diag(softplus(w) + min_var), built once and tiled across the batch lanes.
    w = jax.nn.softplus(w_ref[...]) + min_var                  # [1, D]
    row = jax.lax.broadcasted_iota(jnp.int32, (state_dim, state_dim), 0)
    col = jax.lax.broadcasted_iota(jnp.int32, (state_dim, state_dim), 1)
    H = jnp.where(row == col, w, jnp.zeros((), jnp.float32))   # [D, D]
    H_wide = jnp.concatenate([H] * batch, axis=1)              # [D, B*D]

    # Single unmasked lane-dense store (last dim = B*D = 128).
    cov_ref[...] = (H_wide + C_wide).astype(cov_ref.dtype)


def transition_forward(mu, action, sigma, A, Bm, o, w, *, min_var=1e-3):
    """Pallas implementation of TransitionModel.forward.

    Args:
      mu:     [B, D]     state_dist.loc
      action: [B, Ad]
      sigma:  [B, D, D]  state_dist.covariance_matrix (batched)
      A: [D, D], Bm: [D, Ad], o: [1, D], w: [D]  -- module parameters
    Returns:
      (next_state_mean [B, D], next_state_cov [B, D, D])
    """
    Bsz, D = mu.shape
    Ad = action.shape[1]

    # Wrapper-side layout plumbing (all tiny / contiguous):
    xcat = jnp.concatenate([mu.astype(jnp.float32),
                            action.astype(jnp.float32)], axis=1)   # [B, D+Ad]
    Wcat = jnp.concatenate([A.astype(jnp.float32),
                            Bm.astype(jnp.float32)], axis=1)       # [D, D+Ad]
    sigma2d = sigma.reshape(Bsz * D, D).astype(jnp.float32)         # free reshape
    o2 = o.reshape(1, D).astype(jnp.float32)
    w2 = w.reshape(1, D).astype(jnp.float32)

    kernel = functools.partial(_transition_kernel, min_var=float(min_var),
                               batch=Bsz, state_dim=D)
    mean, cov_wide = pl.pallas_call(
        kernel,
        out_shape=(
            jax.ShapeDtypeStruct((Bsz, D), jnp.float32),
            jax.ShapeDtypeStruct((D, Bsz * D), jnp.float32),   # lane-dense cov
        ),
        grid_spec=pltpu.PrefetchScalarGridSpec(
            num_scalar_prefetch=0,
            grid=(1,),                                          # single grid step
            in_specs=[
                pl.BlockSpec((Bsz, D + Ad), lambda i: (0, 0)),  # [mu | action]
                pl.BlockSpec((Bsz * D, D), lambda i: (0, 0)),   # sigma (stacked)
                pl.BlockSpec((D, D), lambda i: (0, 0)),         # A
                pl.BlockSpec((D, D + Ad), lambda i: (0, 0)),    # [A | B]
                pl.BlockSpec((1, D), lambda i: (0, 0)),         # o
                pl.BlockSpec((1, D), lambda i: (0, 0)),         # w
            ],
            out_specs=[
                pl.BlockSpec((Bsz, D), lambda i: (0, 0)),       # mean
                pl.BlockSpec((D, Bsz * D), lambda i: (0, 0)),   # cov (wide)
            ],
        ),
        compiler_params=pltpu.CompilerParams(
            dimension_semantics=("arbitrary",)),
    )(xcat, sigma2d, A.astype(jnp.float32), Wcat, o2, w2)

    # (D, B*D) -> (D, B, D) -> (B, D, D): trivial wrapper-side transpose.
    cov = cov_wide.reshape(D, Bsz, D).transpose(1, 0, 2)
    return mean, cov


def _reference(mu, action, sigma, A, Bm, o, w, min_var=1e-3):
    wv = jax.nn.softplus(w) + min_var
    mean = mu @ A.T + action @ Bm.T + o
    H = jnp.diag(wv)
    C = H[None] + jnp.einsum('ij,bjk,lk->bil', A, sigma, A)
    return mean, C


if __name__ == "__main__":
    BATCH, STATE_DIM, ACTION_DIM = 4, 32, 8
    MIN_VAR = 1e-3

    key = jax.random.PRNGKey(0)
    k_A, k_B, k_o, k_w, k_mu, k_act, k_L = jax.random.split(key, 7)

    # Deterministic parameter init (shapes from TransitionModel.__init__).
    A = jax.random.normal(k_A, (STATE_DIM, STATE_DIM), jnp.float32)
    Bm = jax.random.normal(k_B, (STATE_DIM, ACTION_DIM), jnp.float32)
    o = jax.random.normal(k_o, (1, STATE_DIM), jnp.float32)
    w = jax.random.normal(k_w, (STATE_DIM,), jnp.float32)

    # Example inputs: state_dist (loc, covariance) and action.
    mu = jax.random.normal(k_mu, (BATCH, STATE_DIM), jnp.float32)
    action = jax.random.normal(k_act, (BATCH, ACTION_DIM), jnp.float32)
    L = 0.1 * jax.random.normal(k_L, (BATCH, STATE_DIM, STATE_DIM), jnp.float32)
    sigma = jnp.einsum('bij,bkj->bik', L, L) + 0.5 * jnp.eye(STATE_DIM)[None]

    mean, cov = transition_forward(mu, action, sigma, A, Bm, o, w,
                                   min_var=MIN_VAR)
    jax.block_until_ready((mean, cov))

    ref_mean, ref_cov = _reference(mu, action, sigma, A, Bm, o, w, MIN_VAR)
    assert jnp.allclose(mean, ref_mean, atol=1e-4, rtol=1e-4)
    assert jnp.allclose(cov, ref_cov, atol=1e-4, rtol=1e-4)

    print("KERNEL_OK")
</pallas_src>

<mosaic_0001>
module attributes {stable_mosaic.version = 11 : i64} {
  func.func @_transition_kernel(%arg0: i32, %arg1: memref<4x40xf32, #tpu.memory_space<vmem>>, %arg2: memref<128x32xf32, #tpu.memory_space<vmem>>, %arg3: memref<32x32xf32, #tpu.memory_space<vmem>>, %arg4: memref<32x40xf32, #tpu.memory_space<vmem>>, %arg5: memref<1x32xf32, #tpu.memory_space<vmem>>, %arg6: memref<1x32xf32, #tpu.memory_space<vmem>>, %arg7: memref<4x32xf32, #tpu.memory_space<vmem>>, %arg8: memref<32x128xf32, #tpu.memory_space<vmem>>) attributes {dimension_semantics = [#tpu.dimension_semantics<arbitrary>], iteration_bounds = array<i64: 1>, scalar_prefetch = 0 : i64, scratch_operands = 0 : i64, tpu.core_type = #tpu.core_type<tc>, window_params = [{pipeline_mode = #tpu.pipeline_mode<synchronous>, transform_indices = @transform_0, window_bounds = array<i64: 4, 40>}, {pipeline_mode = #tpu.pipeline_mode<synchronous>, transform_indices = @transform_1, window_bounds = array<i64: 128, 32>}, {pipeline_mode = #tpu.pipeline_mode<synchronous>, transform_indices = @transform_2, window_bounds = array<i64: 32, 32>}, {pipeline_mode = #tpu.pipeline_mode<synchronous>, transform_indices = @transform_3, window_bounds = array<i64: 32, 40>}, {pipeline_mode = #tpu.pipeline_mode<synchronous>, transform_indices = @transform_4, window_bounds = array<i64: 1, 32>}, {pipeline_mode = #tpu.pipeline_mode<synchronous>, transform_indices = @transform_5, window_bounds = array<i64: 1, 32>}, {pipeline_mode = #tpu.pipeline_mode<synchronous>, transform_indices = @transform_6, window_bounds = array<i64: 4, 32>}, {pipeline_mode = #tpu.pipeline_mode<synchronous>, transform_indices = @transform_7, window_bounds = array<i64: 32, 128>}]} {
    %c0 = arith.constant 0 : index
    %c0_0 = arith.constant 0 : index
    %0 = vector.load %arg3[%c0, %c0_0] : memref<32x32xf32, #tpu.memory_space<vmem>>, vector<32x32xf32>
    %c0_1 = arith.constant 0 : index
    %c0_2 = arith.constant 0 : index
    %1 = vector.load %arg1[%c0_1, %c0_2] : memref<4x40xf32, #tpu.memory_space<vmem>>, vector<4x40xf32>
    %c0_3 = arith.constant 0 : index
    %c0_4 = arith.constant 0 : index
    %2 = vector.load %arg4[%c0_3, %c0_4] : memref<32x40xf32, #tpu.memory_space<vmem>>, vector<32x40xf32>
    %cst = arith.constant dense<0.000000e+00> : vector<4x32xf32>
    %3 = tpu.matmul %1, %2, %cst {dimension_numbers = #tpu.dot_dimension_numbers<[1], [1], [0], [0], [0, 0, 1, 0], [], []>} : vector<4x40xf32>, vector<32x40xf32>, vector<4x32xf32> -> vector<4x32xf32>
    %c0_5 = arith.constant 0 : index
    %c0_6 = arith.constant 0 : index
    %4 = vector.load %arg5[%c0_5, %c0_6] : memref<1x32xf32, #tpu.memory_space<vmem>>, vector<1x32xf32>
    %5 = vector.broadcast %4 : vector<1x32xf32> to vector<4x32xf32>
    %6 = arith.addf %3, %5 : vector<4x32xf32>
    %c0_7 = arith.constant 0 : index
    %c0_8 = arith.constant 0 : index
    %7 = vector.load %arg7[%c0_7, %c0_8] : memref<4x32xf32, #tpu.memory_space<vmem>>, vector<4x32xf32>
    tpu.vector_store %arg7[%c0_7, %c0_8], %6 {strides = array<i32>} : memref<4x32xf32, #tpu.memory_space<vmem>>, vector<4x32xf32>,
    %c0_9 = arith.constant 0 : index
    %c0_10 = arith.constant 0 : index
    %8 = vector.load %arg2[%c0_9, %c0_10] : memref<128x32xf32, #tpu.memory_space<vmem>>, vector<128x32xf32>
    %cst_11 = arith.constant dense<0.000000e+00> : vector<128x32xf32>
    %9 = tpu.matmul %8, %0, %cst_11 {dimension_numbers = #tpu.dot_dimension_numbers<[1], [1], [0], [0], [0, 0, 1, 0], [], []>} : vector<128x32xf32>, vector<32x32xf32>, vector<128x32xf32> -> vector<128x32xf32>
    %10 = vector.extract_strided_slice %9 {offsets = [0, 0], sizes = [32, 32], strides = [1, 1]} : vector<128x32xf32> to vector<32x32xf32>
    %11 = vector.extract_strided_slice %9 {offsets = [32, 0], sizes = [32, 32], strides = [1, 1]} : vector<128x32xf32> to vector<32x32xf32>
    %12 = vector.extract_strided_slice %9 {offsets = [64, 0], sizes = [32, 32], strides = [1, 1]} : vector<128x32xf32> to vector<32x32xf32>
    %13 = vector.extract_strided_slice %9 {offsets = [96, 0], sizes = [32, 32], strides = [1, 1]} : vector<128x32xf32> to vector<32x32xf32>
    %14 = tpu.concatenate %10, %11, %12, %13 in 1 : vector<32x32xf32>, vector<32x32xf32>, vector<32x32xf32>, vector<32x32xf32> -> vector<32x128xf32>
    %cst_12 = arith.constant dense<0.000000e+00> : vector<32x128xf32>
    %15 = tpu.matmul %0, %14, %cst_12 {dimension_numbers = #tpu.dot_dimension_numbers<[1], [0], [0], [1], [0, 0, 1, 1], [], []>} : vector<32x32xf32>, vector<32x128xf32>, vector<32x128xf32> -> vector<32x128xf32>
    %c0_13 = arith.constant 0 : index
    %c0_14 = arith.constant 0 : index
    %16 = vector.load %arg6[%c0_13, %c0_14] : memref<1x32xf32, #tpu.memory_space<vmem>>, vector<1x32xf32>
    %cst_15 = arith.constant 0.000000e+00 : f32
    %17 = vector.broadcast %cst_15 : f32 to vector<1x32xf32>
    %18 = arith.maximumf %16, %17 : vector<1x32xf32>
    %19 = vector.broadcast %cst_15 : f32 to vector<1x32xf32>
    %20 = arith.subf %16, %19 : vector<1x32xf32>
    %21 = arith.cmpf one, %20, %20 : vector<1x32xf32>
    %22 = vector.broadcast %cst_15 : f32 to vector<1x32xf32>
    %23 = arith.addf %16, %22 : vector<1x32xf32>
    %24 = math.absf %20 : vector<1x32xf32>
    %cst_16 = arith.constant 0.000000e+00 : f32
    %25 = vector.broadcast %cst_16 : f32 to vector<1x32xf32>
    %26 = arith.subf %25, %24 : vector<1x32xf32>
    %27 = math.exp %26 : vector<1x32xf32>
    %28 = math.log1p %27 : vector<1x32xf32>
    %29 = arith.addf %18, %28 : vector<1x32xf32>
    %30 = arith.select %21, %23, %29 : vector<1x32xi1>, vector<1x32xf32>
    %cst_17 = arith.constant 1.000000e-03 : f32
    %31 = vector.broadcast %cst_17 : f32 to vector<1x32xf32>
    %32 = arith.addf %30, %31 : vector<1x32xf32>
    %33 = tpu.iota {dimensions = array<i32: 0>} : vector<32x32xi32>
    %34 = tpu.iota {dimensions = array<i32: 1>} : vector<32x32xi32>
    %35 = arith.cmpi eq, %33, %34 : vector<32x32xi32>
    %cst_18 = arith.constant 0.000000e+00 : f32
    %36 = vector.shape_cast %32 : vector<1x32xf32> to vector<1x32xf32>
    %37 = vector.broadcast %36 : vector<1x32xf32> to vector<32x32xf32>
    %38 = vector.broadcast %cst_18 : f32 to vector<32x32xf32>
    %39 = arith.select %35, %37, %38 : vector<32x32xi1>, vector<32x32xf32>
    %40 = tpu.concatenate %39, %39, %39, %39 in 1 : vector<32x32xf32>, vector<32x32xf32>, vector<32x32xf32>, vector<32x32xf32> -> vector<32x128xf32>
    %41 = arith.addf %40, %15 : vector<32x128xf32>
    %c0_19 = arith.constant 0 : index
    %c0_20 = arith.constant 0 : index
    %42 = vector.load %arg8[%c0_19, %c0_20] : memref<32x128xf32, #tpu.memory_space<vmem>>, vector<32x128xf32>
    tpu.vector_store %arg8[%c0_19, %c0_20], %41 {strides = array<i32>} : memref<32x128xf32, #tpu.memory_space<vmem>>, vector<32x128xf32>,
    return
  }
  func.func @transform_0(%arg0: i32) -> (i32, i32) {
    %c0_i32 = arith.constant 0 : i32
    %c0_i32_0 = arith.constant 0 : i32
    %c0_i32_1 = arith.constant 0 : i32
    return %c0_i32, %c0_i32_0 : i32, i32
  }
  func.func @transform_1(%arg0: i32) -> (i32, i32) {
    %c0_i32 = arith.constant 0 : i32
    %c0_i32_0 = arith.constant 0 : i32
    %c0_i32_1 = arith.constant 0 : i32
    return %c0_i32, %c0_i32_0 : i32, i32
  }
  func.func @transform_2(%arg0: i32) -> (i32, i32) {
    %c0_i32 = arith.constant 0 : i32
    %c0_i32_0 = arith.constant 0 : i32
    %c0_i32_1 = arith.constant 0 : i32
    return %c0_i32, %c0_i32_0 : i32, i32
  }
  func.func @transform_3(%arg0: i32) -> (i32, i32) {
    %c0_i32 = arith.constant 0 : i32
    %c0_i32_0 = arith.constant 0 : i32
    %c0_i32_1 = arith.constant 0 : i32
    return %c0_i32, %c0_i32_0 : i32, i32
  }
  func.func @transform_4(%arg0: i32) -> (i32, i32) {
    %c0_i32 = arith.constant 0 : i32
    %c0_i32_0 = arith.constant 0 : i32
    %c0_i32_1 = arith.constant 0 : i32
    return %c0_i32, %c0_i32_0 : i32, i32
  }
  func.func @transform_5(%arg0: i32) -> (i32, i32) {
    %c0_i32 = arith.constant 0 : i32
    %c0_i32_0 = arith.constant 0 : i32
    %c0_i32_1 = arith.constant 0 : i32
    return %c0_i32, %c0_i32_0 : i32, i32
  }
  func.func @transform_6(%arg0: i32) -> (i32, i32) {
    %c0_i32 = arith.constant 0 : i32
    %c0_i32_0 = arith.constant 0 : i32
    %c0_i32_1 = arith.constant 0 : i32
    return %c0_i32, %c0_i32_0 : i32, i32
  }
  func.func @transform_7(%arg0: i32) -> (i32, i32) {
    %c0_i32 = arith.constant 0 : i32
    %c0_i32_0 = arith.constant 0 : i32
    %c0_i32_1 = arith.constant 0 : i32
    return %c0_i32, %c0_i32_0 : i32, i32
  }
}

</mosaic_0001>

<bundles_post_ra>
// kernel: tpu_custom_call.1
= control target key start
LH: loop header
LB: loop body
LE: loop exit
PB: predicated region body
PF: predicated region fallthrough
CT: control target
= control target key end

     0   :  { %13 = vsyncpa [#allocation3], 0  ;;  %vm94_vm0 = vcmask 261120   ;;  %s847_s0 = inlined_call_operand.vmem [shape: f32[4,40], index: 0, kind: input, shape index: {}]   ;;  %s848_s1 = inlined_call_operand.vmem [shape: f32[128,32], index: 1, kind: input, shape index: {}]   ;;  %s849_s2 = inlined_call_operand.vmem [shape: f32[32,32], index: 2, kind: input, shape index: {}]   ;;  %s850_s3 = inlined_call_operand.vmem [shape: f32[32,40], index: 3, kind: input, shape index: {}]   ;;  %s851_s4 = inlined_call_operand.vmem [shape: f32[1,32], index: 4, kind: input, shape index: {}]   ;;  %s852_s5 = inlined_call_operand.vmem [shape: f32[1,32], index: 5, kind: input, shape index: {}]   ;;  %s853_s6 = inlined_call_operand.hbm [shape: f32[4,32], index: 6, kind: output, shape index: {0}]   ;;  %s854_s7 = inlined_call_operand.hbm [shape: f32[32,128], index: 7, kind: output, shape index: {1}]  }
   0x1   :  { %v624_v0 = vld [vmem:[%s849_s2 + $0x18] sm:$0xff]  ;;  %v635_v1 = vld [vmem:[%s849_s2 + $0x10] sm:$0xff] }
   0x2   :  { %448 = vmatpush.xpose.msk.msra.mxu0 %vm94_vm0, %v624_v0  ;;  %472 = vmatpush.xpose.msk.msra.mxu1 %vm94_vm0, %v624_v0 }
   0x3   :  { %473 = vmatpush.xpose.msk.msra.mxu3 %vm94_vm0, %v624_v0 }
   0x6   :  { %449 = vmatpush.xpose.msk.msra.mxu0 %vm94_vm0, %v635_v1  ;;  %474 = vmatpush.xpose.msk.msra.mxu1 %vm94_vm0, %v635_v1 }
   0x7   :  { %14 = vsyncpa [#allocation5], 0  ;;  %475 = vmatpush.xpose.msk.msra.mxu3 %vm94_vm0, %v635_v1  ;;  %v646_v2 = vld [vmem:[%s849_s2 + $0x8] sm:$0xff]  ;;  %v657_v3 = vld [vmem:[%s849_s2] sm:$0xff]  ;;  %s574_s16 = smov 32   ;;  %s575_s17 = smov 64   ;;  %v331_v60 = vlaneseq }
   0x8   :  { %v78_v4 = vld [vmem:[%s848_s1] sm:$0xff]  ;;  %v83_v5 = vld [vmem:[%s848_s1 + $0x28] sm:$0xff]  ;;  %v88_v6 = vld [vmem:[%s848_s1 + $0x50] sm:$0xff]  ;;  %vm40_vm1 = vcmask 326656   ;;  %vm272_vm8 = vcmask 523264   ;;  %vm277_vm9 = vcmask 785408  }
   0x9   :  { %v79_v7 = vld [vmem:[%s848_s1 + $0x8] sm:$0xff]  ;;  %v84_v8 = vld [vmem:[%s848_s1 + $0x30] sm:$0xff]  ;;  %v89_v9 = vld [vmem:[%s848_s1 + $0x58] sm:$0xff]  ;;  %v332_v62 = vshrl.u32 %v331_v60, 7  ;;  %s577_s29 = smov [#allocation2]   ;;  %s416_s10 = sshll.u32 %s853_s6, 4  ;;  %s417_s10 = int_to_ptr.hbm [resolvable:$true] %s416_s10 }
   0xa   :  { %450 = vmatpush.xpose.msk.msra.mxu0 %vm94_vm0, %v646_v2  ;;  %476 = vmatpush.xpose.msk.msra.mxu1 %vm94_vm0, %v646_v2  ;;  %v80_v10 = vld [vmem:[%s848_s1 + $0x10] sm:$0xff]  ;;  %v85_v11 = vld [vmem:[%s848_s1 + $0x38] sm:$0xff]  ;;  %v90_v12 = vld [vmem:[%s848_s1 + $0x60] sm:$0xff]  ;;  %s414_s30 = sshll.u32 %s577_s29, 4  ;;  %vm76_vm10 = vcmask 257024   ;;  %s426_s13 = sshll.u32 %s854_s7, 4  ;;  %s415_s30 = int_to_ptr.vmem [resolvable:$true] %s414_s30  ;;  %s427_s13 = int_to_ptr.hbm [resolvable:$true] %s426_s13 }
   0xb   :  { %477 = vmatpush.xpose.msk.msra.mxu3 %vm94_vm0, %v646_v2  ;;  %v81_v13 = vld [vmem:[%s848_s1 + $0x18] sm:$0xff]  ;;  %v86_v14 = vld [vmem:[%s848_s1 + $0x40] sm:$0xff]  ;;  %v91_v15 = vld [vmem:[%s848_s1 + $0x68] sm:$0xff]  ;;  %s579_s2 = smov 128   ;;  %s580_s14 = smov 8  }
   0xc   :  { %v82_v16 = vld [vmem:[%s848_s1 + $0x20] sm:$0xff]  ;;  %v87_v17 = vld [vmem:[%s848_s1 + $0x48] sm:$0xff]  ;;  %v92_v18 = vld [vmem:[%s848_s1 + $0x70] sm:$0xff] }
   0xd   :  { %v93_v19 = vld [vmem:[%s848_s1 + $0x78] sm:$0xff]  ;;  %s576_s1 = smov 96   ;;  %v311_v42 = vld [vmem:[%s852_s5] sm:$0x1]  ;;  %v34_v45 = vld [vmem:[%s850_s3 + $0x10] sm:$0xff] }
   0xe   :  { %451 = vmatpush.xpose.msk.msra.mxu0 %vm94_vm0, %v657_v3  ;;  %478 = vmatpush.xpose.msk.msra.mxu1 %vm94_vm0, %v657_v3  ;;  %v35_v43 = vld [vmem:[%s850_s3 + $0x18] sm:$0xff]  ;;  %v315_v44 = vand.u32 2147483647, %v311_v42  ;;  %v33_v48 = vld [vmem:[%s850_s3 + $0x8] sm:$0xff]  ;;  %v32_v57 = vld [vmem:[%s850_s3] sm:$0xff]  ;;  %v312_v58 = vmax.f32 %v311_v42, 0.0  ;;  %vm313_vm3 = vcmp.ne.f32.partialorder %v311_v42, %v311_v42 }
   0xf   :  { %479 = vmatpush.xpose.msk.msra.mxu3 %vm94_vm0, %v657_v3  ;;  %443 = vmatpush.xpose.msk.msra.mxu2 %vm40_vm1, %v35_v43 }
  0x10   :  { %v316_v46 = vsub.f32 0.0, %v315_v44 }
  0x11   :  { %452 = vmatmul.msk.f32.vlgmr.msra.gmra.mxu0 %vm94_vm0, %v78_v4  ;;  %457 = vmatmul.msk.f32.vlgmr.msra.gmra.mxu1 %vm94_vm0, %v83_v5  ;;  %v337_v5 = vand.u32 127, %v331_v60 }
  0x12   :  { %462 = vmatmul.msk.f32.vlgmr.msra.gmra.mxu3 %vm94_vm0, %v88_v6  ;;  %v317_v47 = vmul.f32 1.442695, %v316_v46  ;;  %v333_v6 = vadd.s32 8, %v332_v62 }
  0x13   :  { %444 = vmatpush.xpose.msk.msra.mxu2 %vm40_vm1, %v34_v45  ;;  %vm338_vm4 = vcmp.eq.s32.totalorder %v332_v62, %v337_v5 }
  0x14   :  { %518 = vpow2.f32 %v317_v47  ;;  %vm339_vm5 = vcmp.eq.s32.totalorder %v333_v6, %v337_v5 }
  0x17   :  { %445 = vmatpush.xpose.msk.msra.mxu2 %vm40_vm1, %v33_v48 }
  0x19   :  { %453 = vmatmul.msk.f32.gmra.mxu0 %vm94_vm0, %v79_v7  ;;  %458 = vmatmul.msk.f32.gmra.mxu1 %vm94_vm0, %v84_v8  ;;  %v31_v7 = vld [vmem:[%s847_s0] sm:$0xf] }
  0x1a   :  { %463 = vmatmul.msk.f32.gmra.mxu3 %vm94_vm0, %v89_v9  ;;  %v519_v49 = vpop.eup %518 }
  0x1b   :  { %v319_v50 = vadd.f32 1.0, %v519_v49  ;;  %v322_v51 = vmul.f32 -0.5, %v519_v49  ;;  %v325_v54 = vand.u32 2147483647, %v519_v49  ;;  %446 = vmatpush.xpose.msk.msra.mxu2 %vm40_vm1, %v32_v57 }
  0x1d   :  { %520 = vlog2.f32 %v319_v50  ;;  %v323_v52 = vadd.f32 1.0, %v322_v51  ;;  %vm326_vm2 = vcmp.lt.f32.partialorder %v325_v54, 0.0004427343 }
  0x1e   :  { %447 = vmatmul.msk.f32.vlgmr.msra.gmra.mxu2 %vm40_vm1, %v31_v7 }
  0x1f   :  { %v324_v56 = vmul.f32 %v519_v49, %v323_v52 }
  0x21   :  { %454 = vmatmul.msk.f32.gmra.mxu0 %vm94_vm0, %v80_v10  ;;  %459 = vmatmul.msk.f32.gmra.mxu1 %vm94_vm0, %v85_v11  ;;  %v335_v11 = vadd.s32 24, %v332_v62 }
  0x22   :  { %464 = vmatmul.msk.f32.gmra.mxu3 %vm94_vm0, %v90_v12 }
  0x23   :  { %v521_v53 = vpop.eup %520  ;;  %vm341_vm6 = vcmp.eq.s32.totalorder %v335_v11, %v337_v5 }
  0x24   :  { %v321_v55 = vmul.f32 0.6931472, %v521_v53 }
  0x26   :  { %v327_v59 = vsel %vm326_vm2, %v324_v56, %v321_v55 }
  0x27   :  { %v328_v61 = vadd.f32 %v327_v59, %v312_v58 }
  0x29   :  { %455 = vmatmul.msk.f32.gmra.mxu0 %vm94_vm0, %v81_v13  ;;  %460 = vmatmul.msk.f32.gmra.mxu1 %vm94_vm0, %v86_v14  ;;  %v329_v63 = vsel %vm313_vm3, %v311_v42, %v328_v61  ;;  %v334_v14 = vadd.s32 16, %v332_v62 }
  0x2a   :  { %465 = vmatmul.msk.f32.gmra.mxu3 %vm94_vm0, %v91_v15  ;;  %v330_v4 = vadd.f32 0.001, %v329_v63 }
  0x2b   :  { %vm340_vm7 = vcmp.eq.s32.totalorder %v334_v14, %v337_v5 }
  0x2c   :  { %v343_v8 = vperm.slane %v330_v4, 0 }
  0x2e   :  { %v766_v9 = vsel %vm338_vm4, %v343_v8, 0.0  ;;  %v768_v10 = vsel %vm339_vm5, %v343_v8, 0.0  ;;  %v774_v13 = vsel %vm341_vm6, %v343_v8, 0.0  ;;  %v780_v15 = vsel %vm340_vm7, %v343_v8, 0.0 }
  0x31   :  { %456 = vmatmul.msk.f32.gmra.mxu0 %vm94_vm0, %v82_v16  ;;  %461 = vmatmul.msk.f32.gmra.mxu1 %vm94_vm0, %v87_v17 }
  0x32   :  { %466 = vmatmul.msk.f32.gmra.mxu3 %vm94_vm0, %v92_v18 }
  0x3a   :  { %467 = vmatmul.msk.f32.gmra.mxu3 %vm94_vm0, %v93_v19 }
  0x8e   :  { %v187_v20 = vpop.f32.mrf.mxu1  ;;  %v729_v23 = vpop.f32.mrf.mxu0 }
  0x95   :  { %v202_v21 = vpop.f32.mrf.mxu3 }
  0x96   :  { %v190_v22 = vpop.f32.mrf.mxu1  ;;  %v732_v27 = vpop.f32.mrf.mxu0 }
  0x9d   :  { %v205_v24 = vpop.f32.mrf.mxu3 }
  0x9e   :  { %v193_v25 = vpop.f32.mrf.mxu1  ;;  %v492_v30 = vpack.i.bf16 %v202_v21, %v205_v24  ;;  %v735_v33 = vpop.f32.mrf.mxu0 }
  0x9f   :  { %v487_v26 = vpack.i.bf16 %v190_v22, %v193_v25 }
  0xa1   :  { %488 = vrot.lane.b32.xlu0 %v487_v26, %s574_s16 }
  0xa5   :  { %v208_v28 = vpop.f32.mrf.mxu3 }
  0xa6   :  { %v196_v29 = vpop.f32.mrf.mxu1  ;;  %v738_v37 = vpop.f32.mrf.mxu0 }
  0xa9   :  { %493 = vrot.lane.b32.xlu0 %v492_v30, %s575_s17 }
  0xad   :  { %v211_v31 = vpop.f32.mrf.mxu3 }
  0xae   :  { %v199_v32 = vpop.f32.mrf.mxu1  ;;  %v512_v36 = vpack.i.bf16 %v208_v28, %v211_v31  ;;  %v184_v40 = vpop.f32.mrf.mxu0 }
  0xaf   :  { %v507_v34 = vpack.i.bf16 %v196_v29, %v199_v32  ;;  %v502_v41 = vpack.i.bf16 %v184_v40, %v187_v20 }
  0xb1   :  { %508 = vrot.lane.b32.xlu2 %v507_v34, %s575_s17  ;;  %353 = vrot.lane.b32.xlu0 %v766_v9, %s574_s16 }
  0xb5   :  { %v214_v35 = vpop.f32.mrf.mxu3 }
  0xb9   :  { %513 = vrot.lane.b32.xlu2 %v512_v36, %s576_s1  ;;  %359 = vrot.lane.b32.xlu0 %v774_v13, %s574_s16 }
  0xbd   :  { %v217_v38 = vpop.f32.mrf.mxu3 }
  0xbe   :  { %v497_v39 = vpack.i.bf16 %v214_v35, %v217_v38 }
  0xc0   :  { %498 = vrot.lane.b32.xlu1 %v497_v39, %s576_s1 }
  0xc1   :  { %357 = vrot.lane.b32.xlu2 %v780_v15, %s574_s16  ;;  %369 = vrot.lane.b32.xlu0 %v780_v15, %s575_s17 }
  0xc8   :  { %503 = vrot.lane.b32.xlu1 %v502_v41, %s574_s16 }
  0xc9   :  { %367 = vrot.lane.b32.xlu2 %v768_v10, %s575_s17  ;;  %379 = vrot.lane.b32.xlu0 %v768_v10, %s576_s1 }
  0xd0   :  { %355 = vrot.lane.b32.xlu1 %v768_v10, %s574_s16 }
  0xd1   :  { %377 = vrot.lane.b32.xlu2 %v766_v9, %s576_s1 }
  0xd8   :  { %365 = vrot.lane.b32.xlu1 %v766_v9, %s575_s17 }
  0xd9   :  { %383 = vrot.lane.b32.xlu2 %v774_v13, %s576_s1 }
  0xe0   :  { %371 = vrot.lane.b32.xlu1 %v774_v13, %s575_s17 }
  0xe8   :  { %381 = vrot.lane.b32.xlu1 %v780_v15, %s576_s1 }
 0x10b   :  { %v509_v18 = vpop.permute.xlu2 %508 }
 0x10c   :  { %v510_v38 = vunpack.i.l.bf16 %v509_v18 }
 0x113   :  { %v489_v12 = vpop.permute.xlu0 %488  ;;  %v514_v34 = vpop.permute.xlu2 %513 }
 0x114   :  { %v490_v17 = vunpack.i.l.bf16 %v489_v12  ;;  %v491_v20 = vunpack.i.h.bf16 %v489_v12  ;;  %v515_v39 = vunpack.i.l.bf16 %v514_v34  ;;  %v516_v44 = vunpack.i.h.bf16 %v514_v34 }
 0x116   :  { %v271_v26 = vsel %vm94_vm0, %v738_v37, %v490_v17  ;;  %v270_v30 = vsel %vm94_vm0, %v735_v33, %v491_v20  ;;  %v511_v33 = vunpack.i.h.bf16 %v509_v18 }
 0x11b   :  { %v494_v16 = vpop.permute.xlu0 %493 }
 0x11c   :  { %v495_v19 = vunpack.i.l.bf16 %v494_v16  ;;  %v496_v21 = vunpack.i.h.bf16 %v494_v16 }
 0x11e   :  { %v276_v28 = vsel %vm272_vm8, %v271_v26, %v495_v19  ;;  %v275_v31 = vsel %vm272_vm8, %v270_v30, %v496_v21 }
 0x132   :  { %v499_v22 = vpop.permute.xlu1 %498 }
 0x133   :  { %v501_v24 = vunpack.i.h.bf16 %v499_v22  ;;  %v500_v25 = vunpack.i.l.bf16 %v499_v22 }
 0x135   :  { %v281_v29 = vsel %vm277_vm9, %v276_v28, %v500_v25  ;;  %v280_v32 = vsel %vm277_vm9, %v275_v31, %v501_v24 }
 0x136   :  { %294 = vmatpush.msrb.mxu2 %v281_v29 }
 0x138   :  { %295 = vmatpush.msrb.mxu2 %v280_v32 }
 0x13a   :  { %v504_v35 = vpop.permute.xlu1 %503 }
 0x13b   :  { %v506_v36 = vunpack.i.h.bf16 %v504_v35  ;;  %v505_v37 = vunpack.i.l.bf16 %v504_v35 }
 0x13d   :  { %v269_v40 = vsel %vm94_vm0, %v732_v27, %v505_v37  ;;  %v268_v41 = vsel %vm94_vm0, %v729_v23, %v506_v36  ;;  %v517_v23 = vld [vmem:[%s851_s4] ss:$0 sm:$0xff]  ;;  %s578_s4 = smov [#allocation4]  }
 0x13e   :  { %v274_v42 = vsel %vm272_vm8, %v269_v40, %v510_v38  ;;  %v273_v43 = vsel %vm272_vm8, %v268_v41, %v511_v33  ;;  %s424_s6 = sshll.u32 %s578_s4, 4  ;;  %s425_s6 = int_to_ptr.vmem [resolvable:$true] %s424_s6 }
 0x13f   :  { %v279_v45 = vsel %vm277_vm9, %v274_v42, %v515_v39  ;;  %v278_v46 = vsel %vm277_vm9, %v273_v43, %v516_v44 }
 0x140   :  { %296 = vmatpush.msrb.mxu2 %v279_v45 }
 0x142   :  { %297 = vmatpush.msrb.mxu2 %v278_v46 }
 0x143   :  { %468 = vmatmul.msk.f32.vlgmr.msrb.gmra.mxu2 %vm94_vm0, %v657_v3  ;;  %v73_v3 = vpop.f32.mrf.mxu2 }
 0x144   :  { %v74_v27 = vadd.f32 %v517_v23, %v73_v3 }
 0x146   :  { %77 = vst.msk [vmem:[#allocation2] sm:$0xf] %vm76_vm10, %v74_v27 }
 0x147   :  { %419 = dma.vmem_to_hbm [thread:$0]  %s415_s30, 64, %s417_s10, [#allocation3]  }
 0x14b   :  { %469 = vmatmul.msk.f32.gmra.mxu2 %vm94_vm0, %v646_v2  ;;  %v358_v2 = vpop.permute.xlu2 %357 }
 0x14c   :  { %v391_v4 = vsel %vm94_vm0, %v780_v15, %v358_v2 }
 0x153   :  { %470 = vmatmul.msk.f32.gmra.mxu2 %vm94_vm0, %v635_v1  ;;  %v354_v1 = vpop.permute.xlu0 %353  ;;  %v368_v48 = vpop.permute.xlu2 %367 }
 0x154   :  { %v389_v49 = vsel %vm94_vm0, %v766_v9, %v354_v1 }
 0x15b   :  { %471 = vmatmul.msk.f32.gmra.mxu2 %vm94_vm0, %v624_v0  ;;  %v356_v0 = vpop.permute.xlu1 %355  ;;  %v360_v47 = vpop.permute.xlu0 %359 }
 0x15c   :  { %v378_v53 = vpop.permute.xlu2 %377  ;;  %v390_v57 = vsel %vm94_vm0, %v768_v10, %v356_v0  ;;  %v392_v10 = vsel %vm94_vm0, %v774_v13, %v360_v47 }
 0x15d   :  { %v394_v59 = vsel %vm272_vm8, %v390_v57, %v368_v48 }
 0x163   :  { %v366_v50 = vpop.permute.xlu1 %365  ;;  %v370_v52 = vpop.permute.xlu0 %369 }
 0x164   :  { %v393_v51 = vsel %vm272_vm8, %v389_v49, %v366_v50  ;;  %v395_v5 = vsel %vm272_vm8, %v391_v4, %v370_v52  ;;  %v384_v12 = vpop.permute.xlu2 %383 }
 0x165   :  { %v397_v54 = vsel %vm277_vm9, %v393_v51, %v378_v53 }
 0x16b   :  { %v372_v58 = vpop.permute.xlu1 %371  ;;  %v380_v60 = vpop.permute.xlu0 %379 }
 0x16c   :  { %v398_v62 = vsel %vm277_vm9, %v394_v59, %v380_v60  ;;  %v396_v11 = vsel %vm272_vm8, %v392_v10, %v372_v58 }
 0x16d   :  { %v400_v15 = vsel %vm277_vm9, %v396_v11, %v384_v12 }
 0x173   :  { %v382_v6 = vpop.permute.xlu1 %381 }
 0x174   :  { %v399_v8 = vsel %vm277_vm9, %v395_v5, %v382_v6 }
 0x1c6   :  { %v299_v55 = vpop.f32.mrf.mxu2 }
 0x1c7   :  { %v401_v56 = vadd.f32 %v397_v54, %v299_v55 }
 0x1c9   :  { %405 = vst [vmem:[#allocation4] sm:$0xff] %v401_v56 }
 0x1ce   :  { %v302_v61 = vpop.f32.mrf.mxu2 }
 0x1cf   :  { %v402_v63 = vadd.f32 %v398_v62, %v302_v61 }
 0x1d1   :  { %406 = vst [vmem:[#allocation4 + $0x8] sm:$0xff] %v402_v63 }
 0x1d6   :  { %v305_v7 = vpop.f32.mrf.mxu2 }
 0x1d7   :  { %v403_v9 = vadd.f32 %v399_v8, %v305_v7 }
 0x1d9   :  { %407 = vst [vmem:[#allocation4 + $0x10] sm:$0xff] %v403_v9 }
 0x1de   :  { %v308_v14 = vpop.f32.mrf.mxu2 }
 0x1df   :  { %v404_v16 = vadd.f32 %v400_v15, %v308_v14 }
 0x1e1   :  { %408 = vst [vmem:[#allocation4 + $0x18] sm:$0xff] %v404_v16 }
 0x1e2   :  { %432 = dma.vmem_to_hbm [thread:$0]  %s425_s6, 512, %s427_s13, [#allocation5], %s579_s2, %s579_s2, %s580_s14  }
 0x1e3   :  { %570 = dma.done.wait [#allocation3], 64  }
 0x1e4   :  { %571 = vsyncadd [#allocation3], 4294967232 }
 0x1e5   :  { %572 = dma.done.wait [#allocation5], 512  }
 0x1e6   :  { %573 = vsyncadd [#allocation5], 4294966784 }
 0x1e7   :  { %441 = vsyncpa [#allocation3], 1 }
 0x1e8   :  { %442 = vsyncpa [#allocation5], 1 }

</bundles_post_ra>
